<compile_context>
chip_gen: v7x
topology: tpu7x:2x2x1
jax: 0.10.0
libtpu: 0.0.40
codegen_flags: <defaults>
</compile_context>

<pallas_src>
import functools

import jax
import jax.numpy as jnp
from jax import lax
from jax.experimental import pallas as pl
from jax.experimental.pallas import tpu as pltpu


# ----------------------------- fused kernel -------------------------------- #

def _encoder_fused_kernel(*refs, num_layers, slope):
    """Entire Encoder.forward in one kernel.

    refs layout:
      refs[0]                       : x            (B, K0)
      refs[1 + 3*l : 4 + 3*l]       : v_l (N,K), g_l (N,1), b_l (1,N)   per layer
      refs[1 + 3*num_layers]        : w_heads      (2E, H)   [w_mu ; w_sg]
      refs[2 + 3*num_layers]        : b_heads      (1, 2E)
      refs[-1]                      : out          (B, 2E)
    """
    x_ref = refs[0]
    w_heads_ref = refs[1 + 3 * num_layers]
    b_heads_ref = refs[2 + 3 * num_layers]
    out_ref = refs[-1]

    # contraction on dim 1 of both operands: (B,K) x (N,K) -> (B,N), no transpose.
    dn = (((1,), (1,)), ((), ()))

    z = x_ref[...]
    for li in range(num_layers):                       # static unroll (few layers)
        v = refs[1 + 3 * li][...]                      # (N, K)
        g = refs[2 + 3 * li][...]                      # (N, 1)
        b = refs[3 + 3 * li][...]                      # (1, N)
        # row-wise weight norm: w = g * v / ||v||  (rsqrt -> EUP, cheap)
        inv_norm = lax.rsqrt(jnp.sum(v * v, axis=1, keepdims=True))
        w = v * (g * inv_norm)                         # (N, K)
        y = lax.dot_general(z, w, dimension_numbers=dn,
                            preferred_element_type=jnp.float32) + b
        z = jnp.where(y > 0, y, slope * y)             # LeakyReLU(0.2)

    # fused heads: one MXU pass produces [mu | sg] side by side (lane-denser).
    y = lax.dot_general(z, w_heads_ref[...], dimension_numbers=dn,
                        preferred_element_type=jnp.float32) + b_heads_ref[...]
    out_ref[...] = y


# ------------------------------- wrapper ------------------------------------ #

def encoder_forward(x, params):
    """Full Encoder.forward: fused weight-norm MLP + (mu, sg) heads, 1 pallas_call."""
    layers = params["layers"]
    num_layers = len(layers)
    B = x.shape[0]
    E = params["w_mu"].shape[0]

    # Stack the two heads into one weight so the kernel does a single matmul
    # with a 2E-wide (lane-denser) output.
    w_heads = jnp.concatenate([params["w_mu"], params["w_sg"]], axis=0)        # (2E, H)
    b_heads = jnp.concatenate([params["b_mu"], params["b_sg"]], axis=0)        # (2E,)
    b_heads = b_heads.reshape(1, 2 * E)

    inputs = [x]
    for (v, g, b) in layers:
        inputs += [v, g.reshape(-1, 1), b.reshape(1, -1)]
    inputs += [w_heads, b_heads]

    vmem_spec = pl.BlockSpec(memory_space=pltpu.MemorySpace.VMEM)
    kernel = functools.partial(_encoder_fused_kernel,
                               num_layers=num_layers, slope=0.2)

    # TODO(synk): for large batch / hidden sizes, add a batch grid with
    # dimension_semantics=("parallel",) (v6e megacore / v7x 2 TCs), tile N/K to
    # stay under v7x's 64 MiB VMEM, and pad lane dims to 128 / use bf16 MXU
    # inputs. At these shapes everything fits in a single whole-array block.
    out = pl.pallas_call(
        kernel,
        out_shape=jax.ShapeDtypeStruct((B, 2 * E), jnp.float32),
        in_specs=[vmem_spec] * len(inputs),
        out_specs=vmem_spec,
    )(*inputs)

    return out[:, :E], out[:, E:]


# -------------------------- parameter construction ------------------------- #

def init_encoder_params(key, input_shape, encoded_size, arch):
    params = {"layers": []}
    inputs = input_shape
    for arc in arch:
        key, k1, k2, k3 = jax.random.split(key, 4)
        bound = 1.0 / jnp.sqrt(inputs)
        v = jax.random.uniform(k1, (arc, inputs), jnp.float32, -bound, bound)
        # weight_norm initializes g = ||v|| per row (so initially w == v)
        g = jnp.sqrt(jnp.sum(v * v, axis=1))
        b = jax.random.uniform(k2, (arc,), jnp.float32, -bound, bound)
        # perturb g so weight norm is actually exercised (not identity)
        g = g * (1.0 + 0.1 * jax.random.normal(k3, (arc,)))
        params["layers"].append((v, g, b))
        inputs = arc
    key, k1, k2, k3, k4 = jax.random.split(key, 5)
    bound = 1.0 / jnp.sqrt(inputs)
    params["w_mu"] = jax.random.uniform(k1, (encoded_size, inputs), jnp.float32, -bound, bound)
    params["b_mu"] = jax.random.uniform(k2, (encoded_size,), jnp.float32, -bound, bound)
    params["w_sg"] = jax.random.uniform(k3, (encoded_size, inputs), jnp.float32, -bound, bound)
    params["b_sg"] = jax.random.uniform(k4, (encoded_size,), jnp.float32, -bound, bound)
    return params


# ------------------------------ reference ---------------------------------- #

def encoder_forward_ref(x, params):
    z = x
    for (v, g, b) in params["layers"]:
        norm = jnp.sqrt(jnp.sum(v * v, axis=1, keepdims=True))
        w = v * (g[:, None] / norm)
        y = z @ w.T + b
        z = jnp.where(y > 0, y, 0.2 * y)
    mu = z @ params["w_mu"].T + params["b_mu"]
    sg = z @ params["w_sg"].T + params["b_sg"]
    return mu, sg


# --------------------------------- main ------------------------------------ #

if __name__ == "__main__":
    key = jax.random.PRNGKey(0)
    key, kx, kp = jax.random.split(key, 3)

    batch = 8
    input_shape = 32          # flat feature vector input (nn.Linear stack)
    encoded_size = 16
    arch = [64, 48]

    x = jax.random.normal(kx, (batch, input_shape), jnp.float32)
    params = init_encoder_params(kp, input_shape, encoded_size, arch)

    mu, sg = jax.jit(lambda x: encoder_forward(x, params))(x)
    jax.block_until_ready((mu, sg))

    mu_ref, sg_ref = encoder_forward_ref(x, params)
    assert mu.shape == (batch, encoded_size) and sg.shape == (batch, encoded_size)
    assert jnp.allclose(mu, mu_ref, atol=1e-5, rtol=1e-5)
    assert jnp.allclose(sg, sg_ref, atol=1e-5, rtol=1e-5)

    print("KERNEL_OK")
</pallas_src>

<mosaic_0001>
module attributes {stable_mosaic.version = 11 : i64} {
  func.func @_encoder_fused_kernel(%arg0: memref<8x32xf32, #tpu.memory_space<vmem>>, %arg1: memref<64x32xf32, #tpu.memory_space<vmem>>, %arg2: memref<64x1xf32, #tpu.memory_space<vmem>>, %arg3: memref<1x64xf32, #tpu.memory_space<vmem>>, %arg4: memref<48x64xf32, #tpu.memory_space<vmem>>, %arg5: memref<48x1xf32, #tpu.memory_space<vmem>>, %arg6: memref<1x48xf32, #tpu.memory_space<vmem>>, %arg7: memref<32x48xf32, #tpu.memory_space<vmem>>, %arg8: memref<1x32xf32, #tpu.memory_space<vmem>>, %arg9: memref<8x32xf32, #tpu.memory_space<vmem>>) attributes {dimension_semantics = [], scalar_prefetch = 0 : i64, scratch_operands = 0 : i64, tpu.core_type = #tpu.core_type<tc>} {
    %c0 = arith.constant 0 : index
    %c0_0 = arith.constant 0 : index
    %0 = vector.load %arg0[%c0, %c0_0] : memref<8x32xf32, #tpu.memory_space<vmem>>, vector<8x32xf32>
    %c0_1 = arith.constant 0 : index
    %c0_2 = arith.constant 0 : index
    %1 = vector.load %arg1[%c0_1, %c0_2] : memref<64x32xf32, #tpu.memory_space<vmem>>, vector<64x32xf32>
    %c0_3 = arith.constant 0 : index
    %c0_4 = arith.constant 0 : index
    %2 = vector.load %arg2[%c0_3, %c0_4] : memref<64x1xf32, #tpu.memory_space<vmem>>, vector<64x1xf32>
    %c0_5 = arith.constant 0 : index
    %c0_6 = arith.constant 0 : index
    %3 = vector.load %arg3[%c0_5, %c0_6] : memref<1x64xf32, #tpu.memory_space<vmem>>, vector<1x64xf32>
    %4 = arith.mulf %1, %1 : vector<64x32xf32>
    %cst = arith.constant dense<0.000000e+00> : vector<64xf32>
    %5 = vector.multi_reduction <add>, %4, %cst [1] : vector<64x32xf32> to vector<64xf32>
    %6 = vector.shape_cast %5 : vector<64xf32> to vector<64x1xf32>
    %7 = math.rsqrt %6 : vector<64x1xf32>
    %8 = arith.mulf %2, %7 : vector<64x1xf32>
    %9 = vector.broadcast %8 : vector<64x1xf32> to vector<64x32xf32>
    %10 = arith.mulf %1, %9 : vector<64x32xf32>
    %cst_7 = arith.constant dense<0.000000e+00> : vector<8x64xf32>
    %11 = tpu.matmul %0, %10, %cst_7 {dimension_numbers = #tpu.dot_dimension_numbers<[1], [1], [0], [0], [0, 0, 1, 0], [], []>} : vector<8x32xf32>, vector<64x32xf32>, vector<8x64xf32> -> vector<8x64xf32>
    %12 = vector.broadcast %3 : vector<1x64xf32> to vector<8x64xf32>
    %13 = arith.addf %11, %12 : vector<8x64xf32>
    %cst_8 = arith.constant 0.000000e+00 : f32
    %14 = vector.broadcast %cst_8 : f32 to vector<8x64xf32>
    %15 = arith.cmpf ogt, %13, %14 : vector<8x64xf32>
    %cst_9 = arith.constant 2.000000e-01 : f32
    %16 = vector.broadcast %cst_9 : f32 to vector<8x64xf32>
    %17 = arith.mulf %16, %13 : vector<8x64xf32>
    %18 = arith.select %15, %13, %17 : vector<8x64xi1>, vector<8x64xf32>
    %c0_10 = arith.constant 0 : index
    %c0_11 = arith.constant 0 : index
    %19 = vector.load %arg4[%c0_10, %c0_11] : memref<48x64xf32, #tpu.memory_space<vmem>>, vector<48x64xf32>
    %c0_12 = arith.constant 0 : index
    %c0_13 = arith.constant 0 : index
    %20 = vector.load %arg5[%c0_12, %c0_13] : memref<48x1xf32, #tpu.memory_space<vmem>>, vector<48x1xf32>
    %c0_14 = arith.constant 0 : index
    %c0_15 = arith.constant 0 : index
    %21 = vector.load %arg6[%c0_14, %c0_15] : memref<1x48xf32, #tpu.memory_space<vmem>>, vector<1x48xf32>
    %22 = arith.mulf %19, %19 : vector<48x64xf32>
    %cst_16 = arith.constant dense<0.000000e+00> : vector<48xf32>
    %23 = vector.multi_reduction <add>, %22, %cst_16 [1] : vector<48x64xf32> to vector<48xf32>
    %24 = vector.shape_cast %23 : vector<48xf32> to vector<48x1xf32>
    %25 = math.rsqrt %24 : vector<48x1xf32>
    %26 = arith.mulf %20, %25 : vector<48x1xf32>
    %27 = vector.broadcast %26 : vector<48x1xf32> to vector<48x64xf32>
    %28 = arith.mulf %19, %27 : vector<48x64xf32>
    %cst_17 = arith.constant dense<0.000000e+00> : vector<8x48xf32>
    %29 = tpu.matmul %18, %28, %cst_17 {dimension_numbers = #tpu.dot_dimension_numbers<[1], [1], [0], [0], [0, 0, 1, 0], [], []>} : vector<8x64xf32>, vector<48x64xf32>, vector<8x48xf32> -> vector<8x48xf32>
    %30 = vector.broadcast %21 : vector<1x48xf32> to vector<8x48xf32>
    %31 = arith.addf %29, %30 : vector<8x48xf32>
    %cst_18 = arith.constant 0.000000e+00 : f32
    %32 = vector.broadcast %cst_18 : f32 to vector<8x48xf32>
    %33 = arith.cmpf ogt, %31, %32 : vector<8x48xf32>
    %cst_19 = arith.constant 2.000000e-01 : f32
    %34 = vector.broadcast %cst_19 : f32 to vector<8x48xf32>
    %35 = arith.mulf %34, %31 : vector<8x48xf32>
    %36 = arith.select %33, %31, %35 : vector<8x48xi1>, vector<8x48xf32>
    %c0_20 = arith.constant 0 : index
    %c0_21 = arith.constant 0 : index
    %37 = vector.load %arg7[%c0_20, %c0_21] : memref<32x48xf32, #tpu.memory_space<vmem>>, vector<32x48xf32>
    %cst_22 = arith.constant dense<0.000000e+00> : vector<8x32xf32>
    %38 = tpu.matmul %36, %37, %cst_22 {dimension_numbers = #tpu.dot_dimension_numbers<[1], [1], [0], [0], [0, 0, 1, 0], [], []>} : vector<8x48xf32>, vector<32x48xf32>, vector<8x32xf32> -> vector<8x32xf32>
    %c0_23 = arith.constant 0 : index
    %c0_24 = arith.constant 0 : index
    %39 = vector.load %arg8[%c0_23, %c0_24] : memref<1x32xf32, #tpu.memory_space<vmem>>, vector<1x32xf32>
    %40 = vector.broadcast %39 : vector<1x32xf32> to vector<8x32xf32>
    %41 = arith.addf %38, %40 : vector<8x32xf32>
    %c0_25 = arith.constant 0 : index
    %c0_26 = arith.constant 0 : index
    %42 = vector.load %arg9[%c0_25, %c0_26] : memref<8x32xf32, #tpu.memory_space<vmem>>, vector<8x32xf32>
    tpu.vector_store %arg9[%c0_25, %c0_26], %41 {strides = array<i32>} : memref<8x32xf32, #tpu.memory_space<vmem>>, vector<8x32xf32>,
    return
  }
}

</mosaic_0001>

<bundles_post_ra>
// kernel: _lambda_.1
= control target key start
LH: loop header
LB: loop body
LE: loop exit
PB: predicated region body
PF: predicated region fallthrough
CT: control target
= control target key end

     0   :  { %14 = vsyncpa [#allocation3], 0  ;;  %s1225_s0 = inlined_call_operand.hbm [shape: f32[8,32], index: 0, kind: input, shape index: {}]   ;;  %s1226_s1 = inlined_call_operand.hbm [shape: f32[64,32], index: 1, kind: input, shape index: {}]   ;;  %s1227_s2 = inlined_call_operand.hbm [shape: f32[64,1], index: 2, kind: input, shape index: {}]   ;;  %s1228_s3 = inlined_call_operand.vmem [shape: f32[1,64], index: 3, kind: input, shape index: {}]   ;;  %s1229_s4 = inlined_call_operand.hbm [shape: f32[48,64], index: 4, kind: input, shape index: {}]   ;;  %s1230_s5 = inlined_call_operand.hbm [shape: f32[48,1], index: 5, kind: input, shape index: {}]   ;;  %s1231_s6 = inlined_call_operand.vmem [shape: f32[1,48], index: 6, kind: input, shape index: {}]   ;;  %s1232_s7 = inlined_call_operand.hbm [shape: f32[32,48], index: 7, kind: input, shape index: {}]   ;;  %s1233_s8 = inlined_call_operand.vmem [shape: f32[1,32], index: 8, kind: input, shape index: {}]   ;;  %s1234_s9 = inlined_call_operand.vmem [shape: f32[8,32], index: 9, kind: output, shape index: {}]  }
   0x1   :  { %15 = vsyncpa [#allocation5], 0 }
   0x2   :  { %16 = vsyncpa [#allocation8], 0 }
   0x3   :  { %17 = vsyncpa [#allocation11], 0  ;;  %s933_s30 = smov [#allocation4]   ;;  %s793_s13 = scalar_lea.hbm %s1226_s1, 1024 }
   0x4   :  { %s33_s10 = sshll.u32 %s933_s30, 4  ;;  %p794_p0 = scmp.ne.s32.totalorder %s1226_s1, %s793_s13  ;;  %s34_s10 = int_to_ptr.vmem [resolvable:$true] %s33_s10 }
   0x5   :  { %p797_p1 = scmp.lt.u32.totalorder %s793_s13, %s1226_s1 }
   0x7   :  { %p799_p2 = pnand %p797_p1, %p794_p0 }
   0x9   :  { %802 = shalt.err (!%p799_p2)
}
   0xa   :  { %s803_s18 = scalar_lea.vmem %s34_s10, 1024  ;;  %p808_p4 = scmp.lt.s32.totalorder %s34_s10, %s34_s10 }
   0xb   :  { %p804_p3 = scmp.ne.s32.totalorder %s34_s10, %s803_s18  ;;  %p809_p5 = scmp.lt.s32.totalorder %s803_s18, %s803_s18 }
   0xd   :  { %p810_p6 = por %p809_p5, %p808_p4 }
   0xf   :  { %p811_p7 = pnand %p810_p6, %p804_p3 }
  0x11   :  { %814 = shalt.err (!%p811_p7)
}
  0x12   :  { %s934_s19 = smov 128   ;;  %s935_s20 = smov 8  }
  0x13   :  { %39 = dma.hbm_to_vmem [thread:$0]  %s1226_s1, 1024, %s34_s10, [#allocation5], %s934_s19, %s934_s19, %s935_s20  }
  0x14   :  { %s936_s23 = smov [#allocation7]   ;;  %s937_s25 = smov [#allocation2]  }
  0x15   :  { %s59_s24 = sshll.u32 %s936_s23, 4  ;;  %s24_s26 = sshll.u32 %s937_s25, 4  ;;  %s60_s24 = int_to_ptr.vmem [resolvable:$true] %s59_s24  ;;  %s25_s26 = int_to_ptr.vmem [resolvable:$true] %s24_s26 }
  0x16   :  { %s815_s29 = scalar_lea.hbm %s1229_s4, 768 }
  0x17   :  { %p816_p8 = scmp.ne.s32.totalorder %s1229_s4, %s815_s29  ;;  %p819_p9 = scmp.lt.u32.totalorder %s815_s29, %s1229_s4 }
  0x19   :  { %p821_p10 = pnand %p819_p9, %p816_p8 }
  0x1b   :  { %824 = shalt.err (!%p821_p10)
}
  0x1c   :  { %s825_s1 = scalar_lea.vmem %s60_s24, 768  ;;  %p830_p12 = scmp.lt.s32.totalorder %s60_s24, %s60_s24 }
  0x1d   :  { %p826_p11 = scmp.ne.s32.totalorder %s60_s24, %s825_s1  ;;  %p831_p13 = scmp.lt.s32.totalorder %s825_s1, %s825_s1 }
  0x1f   :  { %p832_p0 = por %p831_p13, %p830_p12 }
  0x21   :  { %p833_p1 = pnand %p832_p0, %p826_p11 }
  0x23   :  { %836 = shalt.err (!%p833_p1)
}
  0x24   :  { %65 = dma.hbm_to_vmem [thread:$0]  %s1229_s4, 768, %s60_s24, [#allocation8], %s934_s19, %s934_s19, %s935_s20  }
  0x25   :  { %s837_s17 = scalar_lea.hbm %s1225_s0, 128 }
  0x26   :  { %p838_p2 = scmp.ne.s32.totalorder %s1225_s0, %s837_s17  ;;  %p841_p3 = scmp.lt.u32.totalorder %s837_s17, %s1225_s0 }
  0x28   :  { %p843_p4 = pnand %p841_p3, %p838_p2 }
  0x2a   :  { %846 = shalt.err (!%p843_p4)
}
  0x2b   :  { %s847_s25 = scalar_lea.vmem %s25_s26, 128  ;;  %p852_p6 = scmp.lt.s32.totalorder %s25_s26, %s25_s26 }
  0x2c   :  { %p848_p5 = scmp.ne.s32.totalorder %s25_s26, %s847_s25  ;;  %p853_p7 = scmp.lt.s32.totalorder %s847_s25, %s847_s25 }
  0x2e   :  { %p854_p8 = por %p853_p7, %p852_p6 }
  0x30   :  { %p855_p9 = pnand %p854_p8, %p848_p5 }
  0x32   :  { %858 = shalt.err (!%p855_p9)
}
  0x33   :  { %27 = dma.hbm_to_vmem [thread:$0]  %s1225_s0, 128, %s25_s26, [#allocation3]  }
  0x34   :  { %s938_s27 = smov [#allocation6]   ;;  %s939_s29 = smov [#allocation9]  }
  0x35   :  { %s45_s28 = sshll.u32 %s938_s27, 4  ;;  %s71_s30 = sshll.u32 %s939_s29, 4  ;;  %s46_s28 = int_to_ptr.vmem [resolvable:$true] %s45_s28  ;;  %s72_s30 = int_to_ptr.vmem [resolvable:$true] %s71_s30 }
  0x36   :  { %s859_s13 = scalar_lea.hbm %s1227_s2, 1024 }
  0x37   :  { %p860_p10 = scmp.ne.s32.totalorder %s1227_s2, %s859_s13  ;;  %p863_p11 = scmp.lt.u32.totalorder %s859_s13, %s1227_s2 }
  0x39   :  { %p865_p12 = pnand %p863_p11, %p860_p10 }
  0x3b   :  { %868 = shalt.err (!%p865_p12)
}
  0x3c   :  { %s869_s0 = scalar_lea.vmem %s46_s28, 1024  ;;  %p874_p0 = scmp.lt.s32.totalorder %s46_s28, %s46_s28 }
  0x3d   :  { %p870_p13 = scmp.ne.s32.totalorder %s46_s28, %s869_s0  ;;  %p875_p1 = scmp.lt.s32.totalorder %s869_s0, %s869_s0 }
  0x3f   :  { %p876_p2 = por %p875_p1, %p874_p0 }
  0x41   :  { %p877_p3 = pnand %p876_p2, %p870_p13 }
  0x43   :  { %880 = shalt.err (!%p877_p3)
}
  0x44   :  { %51 = dma.hbm_to_vmem [thread:$0]  %s1227_s2, 1024, %s46_s28, [#allocation5], %s934_s19, %s934_s19, %s935_s20  }
  0x45   :  { %s881_s21 = scalar_lea.hbm %s1230_s5, 768 }
  0x46   :  { %p882_p4 = scmp.ne.s32.totalorder %s1230_s5, %s881_s21  ;;  %p885_p5 = scmp.lt.u32.totalorder %s881_s21, %s1230_s5 }
  0x48   :  { %p887_p6 = pnand %p885_p5, %p882_p4 }
  0x4a   :  { %890 = shalt.err (!%p887_p6)
}
  0x4b   :  { %s891_s24 = scalar_lea.vmem %s72_s30, 768  ;;  %p896_p8 = scmp.lt.s32.totalorder %s72_s30, %s72_s30 }
  0x4c   :  { %p892_p7 = scmp.ne.s32.totalorder %s72_s30, %s891_s24  ;;  %p897_p9 = scmp.lt.s32.totalorder %s891_s24, %s891_s24 }
  0x4e   :  { %p898_p10 = por %p897_p9, %p896_p8 }
  0x50   :  { %p899_p11 = pnand %p898_p10, %p892_p7 }
  0x52   :  { %902 = shalt.err (!%p899_p11)
}
  0x53   :  { %77 = dma.hbm_to_vmem [thread:$0]  %s1230_s5, 768, %s72_s30, [#allocation8], %s934_s19, %s934_s19, %s935_s20  }
  0x54   :  { %s940_s28 = smov [#allocation10]   ;;  %s903_s13 = scalar_lea.hbm %s1232_s7, 512 }
  0x55   :  { %s85_s29 = sshll.u32 %s940_s28, 4  ;;  %p904_p12 = scmp.ne.s32.totalorder %s1232_s7, %s903_s13  ;;  %s86_s29 = int_to_ptr.vmem [resolvable:$true] %s85_s29 }
  0x56   :  { %p907_p13 = scmp.lt.u32.totalorder %s903_s13, %s1232_s7 }
  0x58   :  { %p909_p0 = pnand %p907_p13, %p904_p12 }
  0x5a   :  { %912 = shalt.err (!%p909_p0)
}
  0x5b   :  { %s913_s0 = scalar_lea.vmem %s86_s29, 512  ;;  %p918_p2 = scmp.lt.s32.totalorder %s86_s29, %s86_s29 }
  0x5c   :  { %p914_p1 = scmp.ne.s32.totalorder %s86_s29, %s913_s0  ;;  %p919_p3 = scmp.lt.s32.totalorder %s913_s0, %s913_s0 }
  0x5e   :  { %p920_p4 = por %p919_p3, %p918_p2 }
  0x60   :  { %p921_p5 = pnand %p920_p4, %p914_p1 }
  0x62   :  { %924 = shalt.err (!%p921_p5)
}
  0x63   :  { %91 = dma.hbm_to_vmem [thread:$0]  %s1232_s7, 512, %s86_s29, [#allocation11], %s934_s19, %s934_s19, %s935_s20  }
  0x64   :  { %925 = dma.done.wait [#allocation3], 128  }
  0x65   :  { %926 = vsyncadd [#allocation3], 4294967168 }
  0x66   :  { %927 = dma.done.wait [#allocation5], 2048  }
  0x67   :  { %928 = vsyncadd [#allocation5], 4294965248 }
  0x68   :  { %929 = dma.done.wait [#allocation8], 1536  }
  0x69   :  { %930 = vsyncadd [#allocation8], 4294965760 }
  0x6a   :  { %931 = dma.done.wait [#allocation11], 512  }
  0x6b   :  { %932 = vsyncadd [#allocation11], 4294966784  ;;  %v1082_v0 = vld [vmem:[#allocation4] sm:$0xff]  ;;  %vm138_vm0 = vcmask 261120   ;;  %v1084_v1 = vld [vmem:[#allocation4 + $0x8] sm:$0xff]  ;;  %v941_v24 = vmov 0  }
  0x6c   :  { %v1086_v2 = vld [vmem:[#allocation4 + $0x10] sm:$0xff]  ;;  %v130_v3 = vmul.f32 %v1082_v0, %v1082_v0  ;;  %v131_v4 = vmul.f32 %v1084_v1, %v1084_v1  ;;  %v1094_v6 = vld [vmem:[#allocation4 + $0x18] sm:$0xff]  ;;  %v1098_v8 = vld [vmem:[#allocation4 + $0x20] sm:$0xff]  ;;  %763 = vset.pattern.permute.xlu0 %v941_v24  ;;  %764 = vset.pattern.permute.xlu1 %v941_v24  ;;  %v942_v43 = vmov 0.0|0.0   ;;  %vm352_vm1 = vcmask 523264  }
  0x6d   :  { %v132_v5 = vmul.f32 %v1086_v2, %v1086_v2  ;;  %v133_v7 = vmul.f32 %v1094_v6, %v1094_v6  ;;  %v1100_v9 = vld [vmem:[#allocation4 + $0x28] sm:$0xff]  ;;  %v134_v14 = vmul.f32 %v1098_v8, %v1098_v8  ;;  %v1110_v16 = vld [vmem:[#allocation4 + $0x30] sm:$0xff]  ;;  %v1112_v17 = vld [vmem:[#allocation4 + $0x38] sm:$0xff]  ;;  %715 = vmatprep.subr.bf16.mxu0 %v942_v43  ;;  %731 = vmatprep.subr.bf16.mxu1 %v942_v43  ;;  %vm943_vm2 = vmmov 0  }
  0x6e   :  { %v139_v10 = vsel %vm138_vm0, %v130_v3, 0.0  ;;  %v142_v12 = vsel %vm138_vm0, %v131_v4, 0.0  ;;  %v135_v15 = vmul.f32 %v1100_v9, %v1100_v9  ;;  %v136_v20 = vmul.f32 %v1110_v16, %v1110_v16  ;;  %v121_v29 = vld [vmem:[#allocation6] sm:$0xff]  ;;  %v122_v33 = vld [vmem:[#allocation6 + $0x8] sm:$0xff]  ;;  %v123_v37 = vld [vmem:[#allocation6 + $0x10] sm:$0xff] }
  0x6f   :  { %v145_v11 = vsel %vm138_vm0, %v132_v5, 0.0  ;;  %140 = vadd.xlane.f32.xlu0 %v139_v10  ;;  %v148_v13 = vsel %vm138_vm0, %v133_v7, 0.0  ;;  %v151_v18 = vsel %vm138_vm0, %v134_v14, 0.0  ;;  %v137_v21 = vmul.f32 %v1112_v17, %v1112_v17  ;;  %v124_v42 = vld [vmem:[#allocation6 + $0x18] sm:$0xff]  ;;  %v125_v47 = vld [vmem:[#allocation6 + $0x20] sm:$0xff]  ;;  %v126_v50 = vld [vmem:[#allocation6 + $0x28] sm:$0xff] }
  0x70   :  { %146 = vadd.xlane.f32.xlu1 %v145_v11  ;;  %v154_v19 = vsel %vm138_vm0, %v135_v15, 0.0  ;;  %v157_v22 = vsel %vm138_vm0, %v136_v20, 0.0  ;;  %v127_v53 = vld [vmem:[#allocation6 + $0x30] sm:$0xff]  ;;  %v128_v56 = vld [vmem:[#allocation6 + $0x38] sm:$0xff]  ;;  %v1124_v57 = vld [vmem:[#allocation7 + $0x8] sm:$0xff]  ;;  %v944_v5 = vmov 0.0  }
  0x71   :  { %v160_v23 = vsel %vm138_vm0, %v137_v21, 0.0  ;;  %v347_v59 = vmul.f32 %v1124_v57, %v1124_v57  ;;  %v1128_v60 = vld [vmem:[#allocation7 + $0x10] sm:$0xff]  ;;  %v1133_v63 = vld [vmem:[#allocation7 + $0x20] sm:$0xff]  ;;  %686 = vmatprep.mubr.msk.f32.mxu0 %vm943_vm2, %v944_v5  ;;  %701 = vmatprep.mubr.msk.f32.mxu1 %vm943_vm2, %v944_v5  ;;  %v1152_v15 = vld [vmem:[#allocation7 + $0x28] sm:$0xff]  ;;  %vm530_vm5 = vcmask 392192  }
  0x72   :  { %v348_v62 = vmul.f32 %v1128_v60, %v1128_v60  ;;  %v350_v4 = vmul.f32 %v1133_v63, %v1133_v63  ;;  %v1143_v10 = vld [vmem:[#allocation7] sm:$0xff]  ;;  %vm1162_vm3 = vmpackc.low %vm138_vm0, %vm138_vm0 }
  0x73   :  { %143 = vadd.xlane.f32.xlu0 %v142_v12  ;;  %v356_v61 = vsel %vm352_vm1, %v347_v59, 0.0  ;;  %v346_v11 = vmul.f32 %v1143_v10, %v1143_v10  ;;  %v1147_v12 = vld [vmem:[#allocation7 + $0x18] sm:$0xff]  ;;  %vm1188_vm4 = vmpackc.low %vm352_vm1, %vm352_vm1 }
  0x74   :  { %149 = vadd.xlane.f32.xlu1 %v148_v13  ;;  %v359_v3 = vsel %vm352_vm1, %v348_v62, 0.0  ;;  %v365_v7 = vsel %vm352_vm1, %v350_v4, 0.0  ;;  %v349_v14 = vmul.f32 %v1147_v12, %v1147_v12  ;;  %vm745_vm7 = vmpackc.low %vm530_vm5, %vm530_vm5 }
  0x75   :  { %v353_v13 = vsel %vm352_vm1, %v346_v11, 0.0 }
  0x77   :  { %152 = vadd.xlane.f32.xlu0 %v151_v18  ;;  %v362_v18 = vsel %vm352_vm1, %v349_v14, 0.0 }
  0x78   :  { %155 = vadd.xlane.f32.xlu1 %v154_v19  ;;  %v351_v19 = vmul.f32 %v1152_v15, %v1152_v15 }
  0x7a   :  { %v368_v20 = vsel %vm352_vm1, %v351_v19, 0.0 }
  0x7b   :  { %158 = vadd.xlane.f32.xlu0 %v157_v22 }
  0x7c   :  { %161 = vadd.xlane.f32.xlu1 %v160_v23 }
  0xfc   :  { %v141_v25 = vpop.xlane.xlu0 %140 }
  0xfd   :  { %v147_v26 = vpop.xlane.xlu1 %146  ;;  %765 = vrsqrt.f32 %v141_v25  ;;  %v519_v25 = vld [vmem:[#allocation10] sm:$0xff] }
  0xfe   :  { %767 = vrsqrt.f32 %v147_v26 }
 0x100   :  { %v144_v27 = vpop.xlane.xlu0 %143 }
 0x101   :  { %769 = vrsqrt.f32 %v144_v27  ;;  %v150_v28 = vpop.xlane.xlu1 %149 }
 0x102   :  { %771 = vrsqrt.f32 %v150_v28 }
 0x104   :  { %v153_v30 = vpop.xlane.xlu0 %152 }
 0x105   :  { %773 = vrsqrt.f32 %v153_v30  ;;  %v156_v35 = vpop.xlane.xlu1 %155 }
 0x106   :  { %775 = vrsqrt.f32 %v156_v35 }
 0x107   :  { %v766_v31 = vpop.eup %765 }
 0x108   :  { %v171_v32 = vmul.f32 %v766_v31, %v121_v29  ;;  %v768_v34 = vpop.eup %767  ;;  %v159_v40 = vpop.xlane.xlu0 %158 }
 0x109   :  { %v173_v39 = vmul.f32 %v768_v34, %v123_v37  ;;  %777 = vrsqrt.f32 %v159_v40  ;;  %v162_v45 = vpop.xlane.xlu1 %161  ;;  %v340_v40 = vld [vmem:[#allocation9 + $0x8] sm:$0xff] }
 0x10a   :  { %181 = vperm.xlu0 %763, %v171_v32   ;;  %779 = vrsqrt.f32 %v162_v45  ;;  %v343_v45 = vld [vmem:[#allocation9 + $0x20] sm:$0xff] }
 0x10b   :  { %v770_v36 = vpop.eup %769 }
 0x10c   :  { %v172_v38 = vmul.f32 %v770_v36, %v122_v33  ;;  %v772_v41 = vpop.eup %771 }
 0x10d   :  { %v174_v44 = vmul.f32 %v772_v41, %v124_v42 }
 0x10e   :  { %186 = vperm.xlu1 %764, %v172_v38   ;;  %v112_v38 = vld [vmem:[#allocation2] sm:$0xff] }
 0x10f   :  { %v774_v46 = vpop.eup %773 }
 0x110   :  { %v175_v48 = vmul.f32 %v774_v46, %v125_v47  ;;  %v776_v49 = vpop.eup %775 }
 0x111   :  { %v176_v51 = vmul.f32 %v776_v49, %v126_v50 }
 0x112   :  { %191 = vperm.xlu1 %764, %v173_v39  }
 0x113   :  { %v778_v52 = vpop.eup %777 }
 0x114   :  { %v177_v54 = vmul.f32 %v778_v52, %v127_v53  ;;  %v780_v55 = vpop.eup %779 }
 0x115   :  { %v178_v58 = vmul.f32 %v780_v55, %v128_v56 }
 0x116   :  { %196 = vperm.xlu1 %764, %v174_v44   ;;  %v341_v44 = vld [vmem:[#allocation9 + $0x10] sm:$0xff] }
 0x11a   :  { %201 = vperm.xlu1 %764, %v175_v48  }
 0x11e   :  { %206 = vperm.xlu1 %764, %v176_v51   ;;  %v339_v51 = vld [vmem:[#allocation9] sm:$0xff] }
 0x122   :  { %211 = vperm.xlu1 %764, %v177_v54   ;;  %v342_v54 = vld [vmem:[#allocation9 + $0x18] sm:$0xff] }
 0x126   :  { %216 = vperm.xlu1 %764, %v178_v58   ;;  %v344_v58 = vld [vmem:[#allocation9 + $0x28] sm:$0xff] }
 0x129   :  { %357 = vadd.xlane.f32.xlu0 %v356_v61 }
 0x12d   :  { %360 = vadd.xlane.f32.xlu0 %v359_v3 }
 0x131   :  { %366 = vadd.xlane.f32.xlu0 %v365_v7 }
 0x14a   :  { %354 = vadd.xlane.f32.xlu1 %v353_v13 }
 0x14e   :  { %363 = vadd.xlane.f32.xlu1 %v362_v18 }
 0x152   :  { %369 = vadd.xlane.f32.xlu1 %v368_v20 }
 0x189   :  { %v182_v21 = vpop.permute.xlu0 %181 }
 0x18a   :  { %v219_v23 = vmul.f32 %v182_v21, %v1082_v0 }
 0x18d   :  { %v187_v22 = vpop.permute.xlu1 %186 }
 0x18e   :  { %v220_v24 = vmul.f32 %v187_v22, %v1084_v1 }
 0x190   :  { %v716_v26 = vpack.c.bf16 %v220_v24, %v219_v23 }
 0x191   :  { %v192_v27 = vpop.permute.xlu1 %191 }
 0x192   :  { %718 = vmatpush3.bf16.xpose.msk.msra.mxu0 %vm1162_vm3, %v716_v26  ;;  %v221_v29 = vmul.f32 %v192_v27, %v1086_v2  ;;  %v520_v26 = vld [vmem:[#allocation10 + $0x8] sm:$0xff] }
 0x193   :  { %719 = vmatprep.subr.bf16.mxu0 %v942_v43 }
 0x195   :  { %v197_v28 = vpop.permute.xlu1 %196 }
 0x196   :  { %v222_v0 = vmul.f32 %v197_v28, %v1094_v6 }
 0x198   :  { %v720_v30 = vpack.c.bf16 %v222_v0, %v221_v29  ;;  %v744_v29 = vpack.c.bf16 %v520_v26, %v519_v25  ;;  %v521_v0 = vld [vmem:[#allocation10 + $0x10] sm:$0xff] }
 0x199   :  { %v202_v1 = vpop.permute.xlu1 %201 }
 0x19a   :  { %722 = vmatpush3.bf16.xpose.msk.msra.mxu0 %vm1162_vm3, %v720_v30  ;;  %v223_v32 = vmul.f32 %v202_v1, %v1098_v8  ;;  %v522_v30 = vld [vmem:[#allocation10 + $0x18] sm:$0xff] }
 0x19b   :  { %723 = vmatprep.subr.bf16.mxu0 %v942_v43  ;;  %v748_v1 = vpack.c.bf16 %v522_v30, %v521_v0 }
 0x19d   :  { %v207_v31 = vpop.permute.xlu1 %206 }
 0x19e   :  { %v224_v33 = vmul.f32 %v207_v31, %v1100_v9  ;;  %v635_v31 = vld [vmem:[%s1231_s6] ss:$0 sm:$0xff] }
 0x1a0   :  { %v724_v34 = vpack.c.bf16 %v224_v33, %v223_v32 }
 0x1a1   :  { %v212_v35 = vpop.permute.xlu1 %211 }
 0x1a2   :  { %726 = vmatpush3.bf16.xpose.msk.msra.mxu0 %vm1162_vm3, %v724_v34  ;;  %v225_v6 = vmul.f32 %v212_v35, %v1110_v16 }
 0x1a3   :  { %727 = vmatprep.subr.bf16.mxu0 %v942_v43 }
 0x1a5   :  { %v217_v2 = vpop.permute.xlu1 %216 }
 0x1a6   :  { %v226_v36 = vmul.f32 %v217_v2, %v1112_v17 }
 0x1a8   :  { %v728_v37 = vpack.c.bf16 %v226_v36, %v225_v6 }
 0x1aa   :  { %730 = vmatpush3.bf16.xpose.msk.msra.mxu0 %vm1162_vm3, %v728_v37 }
 0x1b1   :  { %687 = vmatmul.mubr.msk.f32.vlgmr.msra.gmra.mrb[0].mxu0 %vm138_vm0, %v112_v38 }
 0x1b6   :  { %v358_v8 = vpop.xlane.xlu0 %357 }
 0x1b7   :  { %781 = vrsqrt.f32 %v358_v8 }
 0x1ba   :  { %v361_v9 = vpop.xlane.xlu0 %360 }
 0x1bb   :  { %783 = vrsqrt.f32 %v361_v9 }
 0x1be   :  { %v367_v39 = vpop.xlane.xlu0 %366 }
 0x1bf   :  { %785 = vrsqrt.f32 %v367_v39 }
 0x1c1   :  { %v782_v41 = vpop.eup %781 }
 0x1c2   :  { %v378_v42 = vmul.f32 %v782_v41, %v340_v40 }
 0x1c4   :  { %390 = vperm.xlu1 %764, %v378_v42  }
 0x1c5   :  { %v784_v16 = vpop.eup %783 }
 0x1c6   :  { %v379_v17 = vmul.f32 %v784_v16, %v341_v44 }
 0x1c8   :  { %395 = vperm.xlu1 %764, %v379_v17  }
 0x1c9   :  { %v786_v46 = vpop.eup %785 }
 0x1ca   :  { %v381_v47 = vmul.f32 %v786_v46, %v343_v45 }
 0x1cc   :  { %405 = vperm.xlu1 %764, %v381_v47  }
 0x1d7   :  { %v355_v48 = vpop.xlane.xlu1 %354 }
 0x1d8   :  { %787 = vrsqrt.f32 %v355_v48 }
 0x1db   :  { %v364_v49 = vpop.xlane.xlu1 %363 }
 0x1dc   :  { %789 = vrsqrt.f32 %v364_v49 }
 0x1df   :  { %v370_v50 = vpop.xlane.xlu1 %369 }
 0x1e0   :  { %791 = vrsqrt.f32 %v370_v50 }
 0x1e2   :  { %v788_v52 = vpop.eup %787 }
 0x1e3   :  { %v377_v53 = vmul.f32 %v788_v52, %v339_v51 }
 0x1e5   :  { %385 = vperm.xlu0 %763, %v377_v53  }
 0x1e6   :  { %v790_v55 = vpop.eup %789 }
 0x1e7   :  { %v380_v56 = vmul.f32 %v790_v55, %v342_v54 }
 0x1e9   :  { %400 = vperm.xlu0 %763, %v380_v56  }
 0x1ea   :  { %v792_v59 = vpop.eup %791 }
 0x1eb   :  { %v382_v61 = vmul.f32 %v792_v59, %v344_v58 }
 0x1ed   :  { %410 = vperm.xlu0 %763, %v382_v61  }
 0x243   :  { %v391_v62 = vpop.permute.xlu1 %390 }
 0x244   :  { %v414_v4 = vmul.f32 %v391_v62, %v1124_v57 }
 0x247   :  { %v396_v18 = vpop.permute.xlu1 %395 }
 0x248   :  { %v415_v57 = vmul.f32 %v396_v18, %v1128_v60  ;;  %v625_v60 = vld [vmem:[%s1228_s3] ss:$0 sm:$0xff] }
 0x24b   :  { %v406_v21 = vpop.permute.xlu1 %405 }
 0x24c   :  { %v417_v23 = vmul.f32 %v406_v21, %v1133_v63 }
 0x264   :  { %v386_v3 = vpop.permute.xlu0 %385 }
 0x265   :  { %v413_v7 = vmul.f32 %v386_v3, %v1143_v10 }
 0x267   :  { %v732_v13 = vpack.c.bf16 %v414_v4, %v413_v7 }
 0x268   :  { %v401_v14 = vpop.permute.xlu0 %400 }
 0x269   :  { %734 = vmatpush3.bf16.xpose.msk.msra.mxu1 %vm1188_vm4, %v732_v13  ;;  %v416_v19 = vmul.f32 %v401_v14, %v1147_v12 }
 0x26a   :  { %735 = vmatprep.subr.bf16.mxu1 %v942_v43 }
 0x26b   :  { %v736_v20 = vpack.c.bf16 %v416_v19, %v415_v57 }
 0x26c   :  { %v411_v10 = vpop.permute.xlu0 %410 }
 0x26d   :  { %v418_v22 = vmul.f32 %v411_v10, %v1152_v15 }
 0x26f   :  { %v740_v24 = vpack.c.bf16 %v418_v22, %v417_v23 }
 0x271   :  { %738 = vmatpush3.bf16.xpose.msk.msra.mxu1 %vm1188_vm4, %v736_v20 }
 0x272   :  { %739 = vmatprep.subr.bf16.mxu1 %v942_v43 }
 0x279   :  { %742 = vmatpush3.bf16.xpose.msk.msra.mxu1 %vm1188_vm4, %v740_v24 }
 0x27a   :  { %743 = vmatprep.subr.bf16.mxu1 %v942_v43 }
 0x284   :  { %v326_v12 = vpop.f32.mrb[0].mxu0 }
 0x285   :  { %v327_v27 = vadd.f32 %v625_v60, %v326_v12  ;;  %v688_v28 = vpop.f32.mrb[1].mxu0 }
 0x287   :  { %vm330_vm6 = vcmp.gt.f32.partialorder %v327_v27, 0.0  ;;  %v331_v15 = vmul.f32 0.2, %v327_v27 }
 0x289   :  { %v332_v63 = vsel %vm330_vm6, %v327_v27, %v331_v15 }
 0x28a   :  { %702 = vmatmul.mubr.msk.f32.vlgmr.msra.gmra.mrb[0].mxu1 %vm352_vm1, %v332_v63 }
 0x28b   :  { %746 = vmatpush3.bf16.xpose.msk.msra.mxu1 %vm745_vm7, %v744_v29  ;;  %712 = vmatprep.mubr.msk.f32.mxu1 %vm943_vm2, %v944_v5 }
 0x28c   :  { %747 = vmatprep.subr.bf16.mxu1 %v942_v43  ;;  %v643_v43 = vld [vmem:[%s1233_s8] ss:$0 sm:$0xff] }
 0x293   :  { %750 = vmatpush3.bf16.xpose.msk.msra.mxu1 %vm745_vm7, %v748_v1 }
 0x35d   :  { %v512_v32 = vpop.f32.mrb[0].mxu1 }
 0x35e   :  { %v513_v33 = vadd.f32 %v635_v31, %v512_v32  ;;  %v703_v34 = vpop.f32.mrb[1].mxu1 }
 0x360   :  { %vm516_vm8 = vcmp.gt.f32.partialorder %v513_v33, 0.0  ;;  %v517_v35 = vmul.f32 0.2, %v513_v33 }
 0x362   :  { %v518_v2 = vsel %vm516_vm8, %v513_v33, %v517_v35 }
 0x363   :  { %713 = vmatmul.mubr.msk.f32.vlgmr.msra.gmra.mrb[2].mxu1 %vm530_vm5, %v518_v2 }
 0x436   :  { %v612_v5 = vpop.f32.mrb[2].mxu1 }
 0x437   :  { %v613_v6 = vadd.f32 %v643_v43, %v612_v5  ;;  %v714_v36 = vpop.f32.mrb[3].mxu1 }
 0x439   :  { %616 = vst.msk [vmem:[%s1234_s9] sm:$0xff] %vm138_vm0, %v613_v6 }
 0x43a   :  { %621 = vsyncpa [#allocation3], 1 }
 0x43b   :  { %622 = vsyncpa [#allocation5], 1 }
 0x43c   :  { %623 = vsyncpa [#allocation8], 1 }
 0x43d   :  { %624 = vsyncpa [#allocation11], 1 }

</bundles_post_ra>
